<compile_context>
chip_gen: v5e
topology: v5e:2x2
jax: 0.10.0
libtpu: 0.0.40
codegen_flags: <defaults>
</compile_context>

<pallas_src>
import functools

import jax
import jax.numpy as jnp
from jax.experimental import pallas as pl
from jax.experimental.pallas import tpu as pltpu


def _round_up(x, m):
    return ((x + m - 1) // m) * m


def _cdiv(a, b):
    return -(-a // b)


# -----------------------------------------------------------------------------
# Fused Pallas kernel: whole EncoderDecoder forward for one batch chunk.
# -----------------------------------------------------------------------------
def _fused_kernel(src_ref, trg_ref, wsr_ref, encw_ref, encb_ref, wdec_ref,
                  predw_ref, predb_ref, out_ref, *, g, slot_rows, dft,
                  compute_dtype):
    """
    Row layout inside every (1, rows, F) block is "slot-major": slot k occupies
    rows [k*slot_rows, (k+1)*slot_rows); within a slot, row q = local_batch*R + r
    holds fine token j = r*g + k.  With that layout:
      * the tokenizer regroup into coarse tokens is a lane-concat of the g
        (slot_rows, dft) blocks of x (no reshape / strided access),
      * every slice is sublane-aligned (slot_rows is a multiple of 8),
      * the final store is one full-tile aligned store.
    """
    cdt = compute_dtype
    f32 = jnp.float32

    src = src_ref[0, :, :]          # (g*slot_rows, Fs_aug)  [last col: 1/0 valid flag]
    trg = trg_ref[0, :, :]          # (g*slot_rows, Ft_aug)
    wsr = wsr_ref[...]
    encw = encw_ref[...]
    encb = encb_ref[...]
    wdec = wdec_ref[...]
    predw = predw_ref[...]
    predb = predb_ref[...]

    # 1) folded src_embed -> finer_token_dim_reducer.  Bias is the last weight
    #    row times the ones-column, so tokenizer pad rows are exactly zero.
    x = jnp.dot(src.astype(cdt), wsr, preferred_element_type=f32)   # (rows, dft)

    # 2) regroup to coarse tokens (lane-concat of the g slot blocks) and run the
    #    encoder core as ONE matmul against the full (token_dim, token_dim) weight.
    enc_in = jnp.concatenate(
        [x[k * slot_rows:(k + 1) * slot_rows, :] for k in range(g)], axis=-1)
    y = jnp.maximum(
        jnp.dot(enc_in.astype(cdt), encw, preferred_element_type=f32) + encb,
        0.0)                                                          # (slot_rows, token_dim)

    # 3) back to fine-token rows; increaser + trg_embed + decoder fused into one
    #    concat-K matmul: dec_in = [y_slot | trg_slot(+1)], W = [w_ie ; w_td ; b].
    dec_in = jnp.concatenate(
        [jnp.concatenate(
            [y[:, k * dft:(k + 1) * dft],
             trg[k * slot_rows:(k + 1) * slot_rows, :]], axis=-1)
         for k in range(g)], axis=0)                                  # (rows, dft+Ft_aug)
    dec = jnp.maximum(
        jnp.dot(dec_in.astype(cdt), wdec, preferred_element_type=f32), 0.0)

    # 4) prediction_generator; single dense lane-aligned full-tile store.
    out = jnp.dot(dec.astype(cdt), predw, preferred_element_type=f32) + predb
    out_ref[0, :, :] = out.astype(out_ref.dtype)


# -----------------------------------------------------------------------------
# Model (parameters, folding, forward)
# -----------------------------------------------------------------------------
class Args:
    d_model = 32
    decoder_output_size = 4
    desired_finer_token_dim = 16   # < d_model -> reduce_finer_token_dim = True
    num_reshape_token = 4


def init_params(key, args, src_flat_dim, trg_flat_dim, token_dim):
    ks = jax.random.split(key, 16)
    s = 0.1

    def lin(k, i, o):
        kw, kb = jax.random.split(k)
        return (s * jax.random.normal(kw, (i, o), jnp.float32),
                s * jax.random.normal(kb, (o,), jnp.float32))

    p = {}
    p["src_w"], p["src_b"] = lin(ks[0], src_flat_dim, args.d_model)          # src_embed
    p["trg_w"], p["trg_b"] = lin(ks[1], trg_flat_dim, args.d_model)          # trg_embed
    p["red_w"], p["red_b"] = lin(ks[2], args.d_model,
                                 args.desired_finer_token_dim)               # reducer
    p["inc_w"], p["inc_b"] = lin(ks[3], args.desired_finer_token_dim,
                                 args.d_model)                               # increaser
    p["enc_w"], p["enc_b"] = lin(ks[4], token_dim, token_dim)                # encoder core
    p["dec_wt"], p["dec_b"] = lin(ks[5], args.d_model, args.d_model)         # decoder core
    p["dec_we"], _ = lin(ks[6], args.d_model, args.d_model)
    p["pred_w"], p["pred_b"] = lin(ks[7], args.d_model,
                                   args.decoder_output_size)                 # prediction
    return p


def fold_params(params, args):
    """Pre-fold linear-linear pairs once and lay weights out for the kernel."""
    d = args.d_model
    out_size = args.decoder_output_size
    reduce_dim = args.d_model > args.desired_finer_token_dim
    dft = args.desired_finer_token_dim if reduce_dim else d

    if reduce_dim:
        w_sr = params["src_w"] @ params["red_w"]                       # (Fs, dft)
        b_sr = params["src_b"] @ params["red_w"] + params["red_b"]
        w_ie = params["inc_w"] @ params["dec_we"]                      # (dft, d)
        inc_bias = params["inc_b"] @ params["dec_we"]
    else:
        w_sr = params["src_w"]
        b_sr = params["src_b"]
        w_ie = params["dec_we"]
        inc_bias = jnp.zeros((d,), jnp.float32)

    f = {}
    # src path: append bias as an extra weight row (driven by the ones-column),
    # pad K to a sublane multiple.
    Fs = w_sr.shape[0]
    Fsa = _round_up(Fs + 1, 8)
    f["w_sr"] = jnp.pad(jnp.concatenate([w_sr, b_sr.reshape(1, -1)], axis=0),
                        ((0, Fsa - (Fs + 1)), (0, 0)))                 # (Fsa, dft)

    # encoder core: keep the full (token_dim, token_dim) weight as one tile.
    f["enc_w"] = params["enc_w"]
    f["enc_b"] = params["enc_b"].reshape(1, -1)

    # decoder: concat-K weight [w_ie ; w_td ; b_dec ; 0-pad] for
    # dec_in = [y_fine | trg_flat | 1 | 0-pad].
    w_td = params["trg_w"] @ params["dec_wt"]                          # (Ft, d)
    b_dec = params["trg_b"] @ params["dec_wt"] + inc_bias + params["dec_b"]
    Ft = w_td.shape[0]
    Fta = _round_up(Ft + 1, 8)
    trg_part = jnp.pad(jnp.concatenate([w_td, b_dec.reshape(1, -1)], axis=0),
                       ((0, Fta - (Ft + 1)), (0, 0)))
    f["w_dec"] = jnp.concatenate([w_ie, trg_part], axis=0)             # (dft+Fta, d)

    # prediction_generator, output lanes padded to a dense multiple of 128.
    opad = _round_up(out_size, 128)
    f["pred_w"] = jnp.pad(params["pred_w"], ((0, 0), (0, opad - out_size)))
    f["pred_b"] = jnp.pad(params["pred_b"],
                          ((0, opad - out_size),)).reshape(1, opad)
    return f


def encoder_decoder_forward(src, trg, folded, args, compute_dtype=jnp.float32):
    """
    src: (B, N, T_in, F_in)   trg: (B, N, T_out, F_out)
    returns: (B, N, decoder_output_size)
    """
    B, N = src.shape[0], src.shape[1]
    R = args.num_reshape_token
    out_size = args.decoder_output_size
    d = args.d_model
    reduce_dim = args.d_model > args.desired_finer_token_dim
    dft = args.desired_finer_token_dim if reduce_dim else d

    new_N = _cdiv(N, R) * R
    g = new_N // R
    opad = folded["pred_w"].shape[1]
    token_dim = folded["enc_w"].shape[0]
    Fsa = folded["w_sr"].shape[0]            # src K dim (padded, incl. ones col)
    Fta = folded["w_dec"].shape[0] - dft     # trg K dim (padded, incl. ones col)

    src_flat = src.reshape(B, N, -1).astype(jnp.float32)
    trg_flat = trg.reshape(B, N, -1).astype(jnp.float32)
    Fs, Ft = src_flat.shape[-1], trg_flat.shape[-1]

    # ---- grid sizing: big row blocks, but >= 2 parallel blocks when B >= 2
    # so both v7x TensorCores get work. ----
    target_rows = 256
    bc = max(1, min(B, target_rows // max(new_N, 1)))   # batches per block
    nb = _cdiv(B, bc)
    if nb == 1 and B >= 2:
        nb = 2
        bc = _cdiv(B, nb)
    Bp = nb * bc
    slot_rows = _round_up(bc * R, 8)         # sublane-aligned rows per coarse slot
    rows_tot = g * slot_rows                 # rows per grid block

    # ---- layout plumbing (pure data movement, fused by XLA around the call):
    # append a ones-column (bias driver / pad mask), zero-pad the token axis to
    # new_N and the batch axis to Bp, then permute rows to slot-major order
    # (slot k, local batch, coarse row r) with each slot padded to slot_rows. ----
    ones = jnp.ones((B, N, 1), jnp.float32)

    def to_blocks(a_flat, lane_pad_to):
        a = jnp.concatenate([a_flat, ones], axis=-1)
        a = jnp.pad(a, ((0, 0), (0, 0), (0, lane_pad_to - a.shape[-1])))
        a = jnp.pad(a, ((0, Bp - B), (0, new_N - N), (0, 0)))
        F = a.shape[-1]
        a = a.reshape(nb, bc, R, g, F).transpose(0, 3, 1, 2, 4)  # (nb, g, bc, R, F)
        a = a.reshape(nb, g, bc * R, F)
        a = jnp.pad(a, ((0, 0), (0, 0), (0, slot_rows - bc * R), (0, 0)))
        return a.reshape(nb, rows_tot, F)

    src_km = to_blocks(src_flat, Fsa)        # (nb, rows_tot, Fsa)
    trg_km = to_blocks(trg_flat, Fta)        # (nb, rows_tot, Fta)

    # MXU operand dtype (f32 default; bf16 recommended on v6e/v7x).  Weights are
    # cast once here, not per-use inside the kernel; biases stay f32 (they add
    # into f32 accumulators).
    cdt = compute_dtype
    w_sr = folded["w_sr"].astype(cdt)
    enc_w = folded["enc_w"].astype(cdt)
    w_dec = folded["w_dec"].astype(cdt)
    pred_w = folded["pred_w"].astype(cdt)
    enc_b = folded["enc_b"]
    pred_b = folded["pred_b"]

    kernel = functools.partial(_fused_kernel, g=g, slot_rows=slot_rows,
                               dft=dft, compute_dtype=cdt)

    flops = int(2 * nb * (rows_tot * Fsa * dft
                          + slot_rows * token_dim * token_dim
                          + rows_tot * (dft + Fta) * d
                          + rows_tot * d * opad))
    weight_bytes = sum(int(w.size) * w.dtype.itemsize
                       for w in (w_sr, enc_w, enc_b, w_dec, pred_w, pred_b))
    bytes_accessed = int(src_km.size * 4 + trg_km.size * 4
                         + nb * rows_tot * opad * 4 + weight_bytes)

    def const_map(rank):
        return lambda b: (0,) * rank

    out_km = pl.pallas_call(
        kernel,
        out_shape=jax.ShapeDtypeStruct((nb, rows_tot, opad), jnp.float32),
        grid=(nb,),
        in_specs=[
            pl.BlockSpec((1, rows_tot, Fsa), lambda b: (b, 0, 0)),
            pl.BlockSpec((1, rows_tot, Fta), lambda b: (b, 0, 0)),
            pl.BlockSpec(w_sr.shape, const_map(2)),
            pl.BlockSpec(enc_w.shape, const_map(2)),
            pl.BlockSpec(enc_b.shape, const_map(2)),
            pl.BlockSpec(w_dec.shape, const_map(2)),
            pl.BlockSpec(pred_w.shape, const_map(2)),
            pl.BlockSpec(pred_b.shape, const_map(2)),
        ],
        out_specs=pl.BlockSpec((1, rows_tot, opad), lambda b: (b, 0, 0)),
        compiler_params=pltpu.CompilerParams(
            dimension_semantics=("parallel",),
            vmem_limit_bytes=32 * 1024 * 1024),
        cost_estimate=pl.CostEstimate(flops=flops, transcendentals=0,
                                      bytes_accessed=bytes_accessed),
    )(src_km, trg_km, w_sr, enc_w, enc_b, w_dec, pred_w, pred_b)

    # undo the slot-major permutation, drop row / batch / lane padding.
    out = out_km.reshape(nb, g, slot_rows, opad)[:, :, :bc * R, :]
    out = out.reshape(nb, g, bc, R, opad).transpose(0, 2, 3, 1, 4)
    out = out.reshape(Bp, new_N, opad)
    return out[:B, :N, :out_size]


# -----------------------------------------------------------------------------
# Pure-JAX reference (un-fused, un-folded) for correctness checking
# -----------------------------------------------------------------------------
def reference_forward(src, trg, params, args):
    B, N = src.shape[0], src.shape[1]
    h = src.reshape(B, N, -1).astype(jnp.float32) @ params["src_w"] + params["src_b"]
    x = h @ params["red_w"] + params["red_b"]
    new_N = _cdiv(N, args.num_reshape_token) * args.num_reshape_token
    x = jnp.pad(x, ((0, 0), (0, new_N - N), (0, 0)))
    x = x.reshape(B, args.num_reshape_token, -1)
    x = jnp.maximum(x @ params["enc_w"] + params["enc_b"], 0.0)
    x = x.reshape(B, new_N, -1)[:, :N, :]
    enc = x @ params["inc_w"] + params["inc_b"]
    t = trg.reshape(B, N, -1).astype(jnp.float32) @ params["trg_w"] + params["trg_b"]
    dec = jnp.maximum(t @ params["dec_wt"] + enc @ params["dec_we"] + params["dec_b"], 0.0)
    return dec @ params["pred_w"] + params["pred_b"]


# -----------------------------------------------------------------------------
if __name__ == "__main__":
    args = Args()

    B, N = 2, 6                 # N not divisible by num_reshape_token -> padding path
    T_in, F_in = 8, 4
    T_out, F_out = 4, 2

    key = jax.random.PRNGKey(0)
    k_src, k_trg, k_par = jax.random.split(key, 3)
    src = jax.random.normal(k_src, (B, N, T_in, F_in), jnp.float32)
    trg = jax.random.normal(k_trg, (B, N, T_out, F_out), jnp.float32)

    R = args.num_reshape_token
    new_N = _cdiv(N, R) * R
    token_dim = (new_N * args.desired_finer_token_dim) // R
    params = init_params(k_par, args, T_in * F_in, T_out * F_out, token_dim)
    folded = fold_params(params, args)       # one-time weight folding

    fwd = jax.jit(functools.partial(encoder_decoder_forward, args=args))
    out = fwd(src, trg, folded)
    out = jax.block_until_ready(out)

    ref = reference_forward(src, trg, params, args)
    assert out.shape == (B, N, args.decoder_output_size)
    assert jnp.allclose(out, ref, atol=2e-4, rtol=2e-4), "mismatch vs reference"

    print("KERNEL_OK")
</pallas_src>

<mosaic_0001>
module attributes {stable_mosaic.version = 11 : i64} {
  func.func @_fused_kernel(%arg0: i32, %arg1: memref<1x16x40xf32, #tpu.memory_space<vmem>>, %arg2: memref<1x16x16xf32, #tpu.memory_space<vmem>>, %arg3: memref<40x16xf32, #tpu.memory_space<vmem>>, %arg4: memref<32x32xf32, #tpu.memory_space<vmem>>, %arg5: memref<1x32xf32, #tpu.memory_space<vmem>>, %arg6: memref<32x32xf32, #tpu.memory_space<vmem>>, %arg7: memref<32x128xf32, #tpu.memory_space<vmem>>, %arg8: memref<1x128xf32, #tpu.memory_space<vmem>>, %arg9: memref<1x16x128xf32, #tpu.memory_space<vmem>>) attributes {dimension_semantics = [#tpu.dimension_semantics<parallel>], iteration_bounds = array<i64: 2>, scalar_prefetch = 0 : i64, scratch_operands = 0 : i64, tpu.core_type = #tpu.core_type<tc>, window_params = [{transform_indices = @transform_0, window_bounds = array<i64: 1, 16, 40>}, {transform_indices = @transform_1, window_bounds = array<i64: 1, 16, 16>}, {pipeline_mode = #tpu.pipeline_mode<synchronous>, transform_indices = @transform_2, window_bounds = array<i64: 40, 16>}, {pipeline_mode = #tpu.pipeline_mode<synchronous>, transform_indices = @transform_3, window_bounds = array<i64: 32, 32>}, {pipeline_mode = #tpu.pipeline_mode<synchronous>, transform_indices = @transform_4, window_bounds = array<i64: 1, 32>}, {pipeline_mode = #tpu.pipeline_mode<synchronous>, transform_indices = @transform_5, window_bounds = array<i64: 32, 32>}, {pipeline_mode = #tpu.pipeline_mode<synchronous>, transform_indices = @transform_6, window_bounds = array<i64: 32, 128>}, {pipeline_mode = #tpu.pipeline_mode<synchronous>, transform_indices = @transform_7, window_bounds = array<i64: 1, 128>}, {transform_indices = @transform_8, window_bounds = array<i64: 1, 16, 128>}]} {
    %c0 = arith.constant 0 : index
    %c0_0 = arith.constant 0 : index
    %c0_1 = arith.constant 0 : index
    %0 = vector.load %arg1[%c0, %c0_0, %c0_1] : memref<1x16x40xf32, #tpu.memory_space<vmem>>, vector<1x16x40xf32>
    %1 = vector.shape_cast %0 : vector<1x16x40xf32> to vector<16x40xf32>
    %c0_2 = arith.constant 0 : index
    %c0_3 = arith.constant 0 : index
    %c0_4 = arith.constant 0 : index
    %2 = vector.load %arg2[%c0_2, %c0_3, %c0_4] : memref<1x16x16xf32, #tpu.memory_space<vmem>>, vector<1x16x16xf32>
    %3 = vector.shape_cast %2 : vector<1x16x16xf32> to vector<16x16xf32>
    %c0_5 = arith.constant 0 : index
    %c0_6 = arith.constant 0 : index
    %4 = vector.load %arg3[%c0_5, %c0_6] : memref<40x16xf32, #tpu.memory_space<vmem>>, vector<40x16xf32>
    %c0_7 = arith.constant 0 : index
    %c0_8 = arith.constant 0 : index
    %5 = vector.load %arg4[%c0_7, %c0_8] : memref<32x32xf32, #tpu.memory_space<vmem>>, vector<32x32xf32>
    %c0_9 = arith.constant 0 : index
    %c0_10 = arith.constant 0 : index
    %6 = vector.load %arg5[%c0_9, %c0_10] : memref<1x32xf32, #tpu.memory_space<vmem>>, vector<1x32xf32>
    %c0_11 = arith.constant 0 : index
    %c0_12 = arith.constant 0 : index
    %7 = vector.load %arg6[%c0_11, %c0_12] : memref<32x32xf32, #tpu.memory_space<vmem>>, vector<32x32xf32>
    %c0_13 = arith.constant 0 : index
    %c0_14 = arith.constant 0 : index
    %8 = vector.load %arg7[%c0_13, %c0_14] : memref<32x128xf32, #tpu.memory_space<vmem>>, vector<32x128xf32>
    %c0_15 = arith.constant 0 : index
    %c0_16 = arith.constant 0 : index
    %9 = vector.load %arg8[%c0_15, %c0_16] : memref<1x128xf32, #tpu.memory_space<vmem>>, vector<1x128xf32>
    %cst = arith.constant dense<0.000000e+00> : vector<16x16xf32>
    %10 = tpu.matmul %1, %4, %cst {dimension_numbers = #tpu.dot_dimension_numbers<[1], [0], [0], [1], [0, 0, 1, 1], [], []>} : vector<16x40xf32>, vector<40x16xf32>, vector<16x16xf32> -> vector<16x16xf32>
    %11 = vector.extract_strided_slice %10 {offsets = [0, 0], sizes = [8, 16], strides = [1, 1]} : vector<16x16xf32> to vector<8x16xf32>
    %12 = vector.extract_strided_slice %10 {offsets = [8, 0], sizes = [8, 16], strides = [1, 1]} : vector<16x16xf32> to vector<8x16xf32>
    %13 = tpu.concatenate %11, %12 in 1 : vector<8x16xf32>, vector<8x16xf32> -> vector<8x32xf32>
    %cst_17 = arith.constant dense<0.000000e+00> : vector<8x32xf32>
    %14 = tpu.matmul %13, %5, %cst_17 {dimension_numbers = #tpu.dot_dimension_numbers<[1], [0], [0], [1], [0, 0, 1, 1], [], []>} : vector<8x32xf32>, vector<32x32xf32>, vector<8x32xf32> -> vector<8x32xf32>
    %15 = vector.broadcast %6 : vector<1x32xf32> to vector<8x32xf32>
    %16 = arith.addf %14, %15 : vector<8x32xf32>
    %cst_18 = arith.constant 0.000000e+00 : f32
    %17 = vector.broadcast %cst_18 : f32 to vector<8x32xf32>
    %18 = arith.maximumf %16, %17 : vector<8x32xf32>
    %19 = vector.extract_strided_slice %18 {offsets = [0, 0], sizes = [8, 16], strides = [1, 1]} : vector<8x32xf32> to vector<8x16xf32>
    %20 = vector.extract_strided_slice %3 {offsets = [0, 0], sizes = [8, 16], strides = [1, 1]} : vector<16x16xf32> to vector<8x16xf32>
    %21 = tpu.concatenate %19, %20 in 1 : vector<8x16xf32>, vector<8x16xf32> -> vector<8x32xf32>
    %22 = vector.extract_strided_slice %18 {offsets = [0, 16], sizes = [8, 16], strides = [1, 1]} : vector<8x32xf32> to vector<8x16xf32>
    %23 = vector.extract_strided_slice %3 {offsets = [8, 0], sizes = [8, 16], strides = [1, 1]} : vector<16x16xf32> to vector<8x16xf32>
    %24 = tpu.concatenate %22, %23 in 1 : vector<8x16xf32>, vector<8x16xf32> -> vector<8x32xf32>
    %25 = tpu.concatenate %21, %24 in 0 : vector<8x32xf32>, vector<8x32xf32> -> vector<16x32xf32>
    %cst_19 = arith.constant dense<0.000000e+00> : vector<16x32xf32>
    %26 = tpu.matmul %25, %7, %cst_19 {dimension_numbers = #tpu.dot_dimension_numbers<[1], [0], [0], [1], [0, 0, 1, 1], [], []>} : vector<16x32xf32>, vector<32x32xf32>, vector<16x32xf32> -> vector<16x32xf32>
    %cst_20 = arith.constant 0.000000e+00 : f32
    %27 = vector.broadcast %cst_20 : f32 to vector<16x32xf32>
    %28 = arith.maximumf %26, %27 : vector<16x32xf32>
    %cst_21 = arith.constant dense<0.000000e+00> : vector<16x128xf32>
    %29 = tpu.matmul %28, %8, %cst_21 {dimension_numbers = #tpu.dot_dimension_numbers<[1], [0], [0], [1], [0, 0, 1, 1], [], []>} : vector<16x32xf32>, vector<32x128xf32>, vector<16x128xf32> -> vector<16x128xf32>
    %30 = vector.broadcast %9 : vector<1x128xf32> to vector<16x128xf32>
    %31 = arith.addf %29, %30 : vector<16x128xf32>
    %c0_22 = arith.constant 0 : index
    %c0_23 = arith.constant 0 : index
    %c0_24 = arith.constant 0 : index
    %32 = vector.load %arg9[%c0_22, %c0_23, %c0_24] : memref<1x16x128xf32, #tpu.memory_space<vmem>>, vector<1x16x128xf32>
    %33 = vector.shape_cast %32 : vector<1x16x128xf32> to vector<16x128xf32>
    %34 = vector.shape_cast %31 : vector<16x128xf32> to vector<1x16x128xf32>
    tpu.vector_store %arg9[%c0_22, %c0_23, %c0_24], %34 {strides = array<i32>} : memref<1x16x128xf32, #tpu.memory_space<vmem>>, vector<1x16x128xf32>,
    return
  }
  func.func @transform_0(%arg0: i32) -> (i32, i32, i32) {
    %c0_i32 = arith.constant 0 : i32
    %c0_i32_0 = arith.constant 0 : i32
    %c0_i32_1 = arith.constant 0 : i32
    return %arg0, %c0_i32, %c0_i32_0 : i32, i32, i32
  }
  func.func @transform_1(%arg0: i32) -> (i32, i32, i32) {
    %c0_i32 = arith.constant 0 : i32
    %c0_i32_0 = arith.constant 0 : i32
    %c0_i32_1 = arith.constant 0 : i32
    return %arg0, %c0_i32, %c0_i32_0 : i32, i32, i32
  }
  func.func @transform_2(%arg0: i32) -> (i32, i32) {
    %c0_i32 = arith.constant 0 : i32
    %c0_i32_0 = arith.constant 0 : i32
    %c0_i32_1 = arith.constant 0 : i32
    return %c0_i32, %c0_i32_0 : i32, i32
  }
  func.func @transform_3(%arg0: i32) -> (i32, i32) {
    %c0_i32 = arith.constant 0 : i32
    %c0_i32_0 = arith.constant 0 : i32
    %c0_i32_1 = arith.constant 0 : i32
    return %c0_i32, %c0_i32_0 : i32, i32
  }
  func.func @transform_4(%arg0: i32) -> (i32, i32) {
    %c0_i32 = arith.constant 0 : i32
    %c0_i32_0 = arith.constant 0 : i32
    %c0_i32_1 = arith.constant 0 : i32
    return %c0_i32, %c0_i32_0 : i32, i32
  }
  func.func @transform_5(%arg0: i32) -> (i32, i32) {
    %c0_i32 = arith.constant 0 : i32
    %c0_i32_0 = arith.constant 0 : i32
    %c0_i32_1 = arith.constant 0 : i32
    return %c0_i32, %c0_i32_0 : i32, i32
  }
  func.func @transform_6(%arg0: i32) -> (i32, i32) {
    %c0_i32 = arith.constant 0 : i32
    %c0_i32_0 = arith.constant 0 : i32
    %c0_i32_1 = arith.constant 0 : i32
    return %c0_i32, %c0_i32_0 : i32, i32
  }
  func.func @transform_7(%arg0: i32) -> (i32, i32) {
    %c0_i32 = arith.constant 0 : i32
    %c0_i32_0 = arith.constant 0 : i32
    %c0_i32_1 = arith.constant 0 : i32
    return %c0_i32, %c0_i32_0 : i32, i32
  }
  func.func @transform_8(%arg0: i32) -> (i32, i32, i32) {
    %c0_i32 = arith.constant 0 : i32
    %c0_i32_0 = arith.constant 0 : i32
    %c0_i32_1 = arith.constant 0 : i32
    return %arg0, %c0_i32, %c0_i32_0 : i32, i32, i32
  }
}

</mosaic_0001>

<bundles_post_ra>
// kernel: encoder_decoder_forward.1
= control target key start
LH: loop header
LB: loop body
LE: loop exit
PB: predicated region body
PF: predicated region fallthrough
CT: control target
= control target key end

     0   :  { %s649_s27 = smov 0   ;;  %s742_s0 = inlined_call_operand.vmem [shape: f32[2,16,40], index: 0, kind: input, shape index: {}]   ;;  %s743_s1 = inlined_call_operand.vmem [shape: f32[2,16,16], index: 1, kind: input, shape index: {}]   ;;  %s744_s2 = inlined_call_operand.vmem [shape: f32[40,16], index: 2, kind: input, shape index: {}]   ;;  %s745_s3 = inlined_call_operand.vmem [shape: f32[32,32], index: 3, kind: input, shape index: {}]   ;;  %s746_s4 = inlined_call_operand.vmem [shape: f32[1,32], index: 4, kind: input, shape index: {}]   ;;  %s747_s5 = inlined_call_operand.vmem [shape: f32[32,32], index: 5, kind: input, shape index: {}]   ;;  %s748_s6 = inlined_call_operand.vmem [shape: f32[32,128], index: 6, kind: input, shape index: {}]   ;;  %s749_s7 = inlined_call_operand.vmem [shape: f32[1,128], index: 7, kind: input, shape index: {}]   ;;  %s750_s8 = inlined_call_operand.vmem [shape: f32[2,16,128], index: 8, kind: output, shape index: {}]  }
   0x1 LB: > { %s559_s28 = sadd.s32 4294967295, %s600_s27   ;;  %p563_p0 = scmp.ge.s32.totalorder %s600_s27, 1  ;;  %s600_s27 = sphi %s649_s27, %s18_s27  }
   0x2   : > { %p272_p1 = scmp.lt.s32.totalorder %s600_s27, 3 }
   0x4   : > { %p273_p2 = pnand %p563_p0, %p272_p1 }
   0x5   : > { %p311_p3 = scmp.lt.s32.totalorder (!%p273_p2), %s559_s28, 1  ;;  %s603_s23 = smov (!%p273_p2), 112  }
   0x6   : > { %276 = sbr.rel (%p273_p2) target bundleno = 794 (0x31a), region = 52 }
   0xb   : > { %v334_v0 = vld [vmem:[%s744_s2 + $0x20] sm:$0xff]  ;;  %v333_v1 = vld [vmem:[%s744_s2 + $0x18] sm:$0xff]  ;;  %v332_v2 = vld [vmem:[%s744_s2 + $0x10] sm:$0xff]  ;;  %s752_s28 = smov (!%p311_p3, %s559_s28), 1  ;;  %vm349_vm0 = vcmask 326656   ;;  %vm383_vm1 = vcmask 130048  }
   0xc   : > { %367 = vmatpush.msra.mxu0 %v334_v0  ;;  %v331_v3 = vld [vmem:[%s744_s2 + $0x8] sm:$0xff]  ;;  %s669_s15 = sshll.u32 %s752_s28, 4  ;;  %v330_v4 = vld [vmem:[%s744_s2] sm:$0xff]  ;;  %v338_v7 = vld [vmem:[%s745_s3 + $0x18] sm:$0xff]  ;;  %s602_s28 = smov 16   ;;  %vm388_vm2 = vcmask 261120  }
   0xd   : > { %s315_s18 = scalar_lea.vmem %s742_s0, %s669_s15  ;;  %v337_v8 = vld [vmem:[%s745_s3 + $0x10] sm:$0xff]  ;;  %404 = vmatpush.msra.mxu1 %v338_v7  ;;  %v336_v9 = vld [vmem:[%s745_s3 + $0x8] sm:$0xff]  ;;  %s320_s9 = scalar_lea.vmem %s743_s1, %s669_s15  ;;  %v335_v12 = vld [vmem:[%s745_s3] sm:$0xff] }
   0xe   : > { %368 = vmatpush.msra.mxu0 %v333_v1  ;;  %v326_v5 = vld [vmem:[%s315_s18] sm:$0xff]  ;;  %v327_v6 = vld [vmem:[%s315_s18 + $0x8] sm:$0xff]  ;;  %v343_v14 = vld [vmem:[%s747_s5 + $0x18] sm:$0xff]  ;;  %s325_s16 = scalar_lea.vmem %s750_s8, %s669_s15 }
   0xf   : > { %405 = vmatpush.msra.mxu1 %v337_v8  ;;  %v328_v13 = vld [vmem:[%s320_s9] sm:$0xff]  ;;  %445 = vmatpush.msra.mxu2 %v343_v14  ;;  %v342_v17 = vld [vmem:[%s747_s5 + $0x10] sm:$0xff]  ;;  %v341_v18 = vld [vmem:[%s747_s5 + $0x8] sm:$0xff] }
  0x10   : > { %369 = vmatpush.msra.mxu0 %v332_v2  ;;  %v340_v19 = vld [vmem:[%s747_s5] sm:$0xff]  ;;  %v329_v26 = vld [vmem:[%s320_s9 + $0x8] sm:$0xff]  ;;  %v347_v27 = vld [vmem:[%s748_s6 + $0x18] sm:$0xff] }
  0x11   : > { %406 = vmatpush.msra.mxu1 %v336_v9  ;;  %446 = vmatpush.msra.mxu2 %v342_v17  ;;  %v592_v20 = vld [vmem:[%s746_s4] ss:$0 sm:$0xff]  ;;  %v346_v28 = vld [vmem:[%s748_s6 + $0x10] sm:$0xff]  ;;  %v345_v29 = vld [vmem:[%s748_s6 + $0x8] sm:$0xff] }
  0x12   : > { %370 = vmatpush.msra.mxu0 %v331_v3  ;;  %479 = vmatpush.msra.mxu3 %v347_v27  ;;  %v344_v30 = vld [vmem:[%s748_s6] sm:$0xff] }
  0x13   : > { %407 = vmatpush.msra.mxu1 %v335_v12  ;;  %447 = vmatpush.msra.mxu2 %v341_v18  ;;  %v593_v38 = vld [vmem:[%s749_s7] ss:$0 sm:$0xff] }
  0x14   : > { %371 = vmatpush.msra.mxu0 %v330_v4  ;;  %480 = vmatpush.msra.mxu3 %v346_v28 }
  0x15   : > { %570 = vmatmul.msk.f32.vlgmr.msra.gmra.mxu0 %vm349_vm0, %v326_v5  ;;  %448 = vmatpush.msra.mxu2 %v340_v19 }
  0x16   : > { %481 = vmatpush.msra.mxu3 %v345_v29 }
  0x18   : > { %482 = vmatpush.msra.mxu3 %v344_v30 }
  0x1d   : > { %571 = vmatmul.msk.f32.gmra.mxu0 %vm349_vm0, %v327_v6 }
  0x92   : > { %v373_v10 = vpop.f32.mrf.mxu0 }
  0x9a   : > { %v376_v11 = vpop.f32.mrf.mxu0 }
  0x9b   : > { %380 = vrot.lane.b32.xlu0 %v376_v11, %s602_s28 }
  0xa3   : > { %414 = vrot.lane.b32.xlu0 %v328_v13, %s602_s28 }
 0x10d   : > { %v381_v15 = vpop.permute.xlu0 %380 }
 0x10e   : > { %v384_v16 = vsel %vm383_vm1, %v373_v10, %v381_v15 }
 0x10f   : > { %572 = vmatmul.msk.f32.vlgmr.msra.gmra.mxu1 %vm388_vm2, %v384_v16 }
 0x115   : > { %v415_v23 = vpop.permute.xlu0 %414 }
 0x18c   : > { %v409_v21 = vpop.f32.mrf.mxu1 }
 0x18d   : > { %v410_v22 = vadd.f32 %v592_v20, %v409_v21 }
 0x18f   : > { %v412_v24 = vmax.f32 %v410_v22, 0.0 }
 0x191   : > { %419 = vrot.lane.b32.xlu1 %v412_v24, %s603_s23  ;;  %v417_v25 = vsel %vm383_vm1, %v412_v24, %v415_v23 }
 0x192   : > { %573 = vmatmul.msk.f32.vlgmr.msra.gmra.mxu2 %vm388_vm2, %v417_v25 }
 0x199   : > { %423 = vrot.lane.b32.xlu1 %v329_v26, %s602_s28 }
 0x203   : > { %v420_v31 = vpop.permute.xlu1 %419 }
 0x20b   : > { %v424_v32 = vpop.permute.xlu1 %423 }
 0x20c   : > { %v426_v33 = vsel %vm383_vm1, %v420_v31, %v424_v32 }
 0x20d   : > { %574 = vmatmul.msk.f32.gmra.mxu2 %vm388_vm2, %v426_v33 }
 0x215   : > { %v450_v34 = vpop.f32.mrf.mxu2 }
 0x216   : > { %v456_v35 = vmax.f32 %v450_v34, 0.0 }
 0x218   : > { %575 = vmatmul.msk.f32.vlgmr.msra.gmra.mxu3 %vm388_vm2, %v456_v35 }
 0x290   : > { %v453_v36 = vpop.f32.mrf.mxu2 }
 0x291   : > { %v457_v37 = vmax.f32 %v453_v36, 0.0 }
 0x293   : > { %576 = vmatmul.msk.f32.gmra.mxu3 %vm388_vm2, %v457_v37 }
 0x29b   : > { %v484_v39 = vpop.f32.mrf.mxu3 }
 0x29c   : > { %v485_v40 = vadd.f32 %v593_v38, %v484_v39 }
 0x29e   : > { %490 = vst [vmem:[%s325_s16] sm:$0xff] %v485_v40 }
 0x316   : > { %v487_v41 = vpop.f32.mrf.mxu3 }
 0x317   : > { %v488_v42 = vadd.f32 %v593_v38, %v487_v41 }
 0x319   : > { %491 = vst [vmem:[%s325_s16 + $0x8] sm:$0xff] %v488_v42 }
 0x31a PF: > { %s18_s27 = sadd.s32 1, %s600_s27  }
 0x31b   : > { %p15_p4 = scmp.ge.s32.totalorder %s18_s27, 4  }
 0x31d   :  { %17 = sbr.rel (!%p15_p4) target bundleno = 1 (0x1), region = 85 }

</bundles_post_ra>
